<compile_context>
chip_gen: v6e
topology: v6e:2x2x1
jax: 0.10.0
libtpu: 0.0.40
codegen_flags: <defaults>
</compile_context>

<pallas_src>
import math

import jax
import jax.numpy as jnp
from jax.experimental import pallas as pl
from jax.experimental.pallas import tpu as pltpu


# ----------------------------------------------------------------------------
# Pallas kernel: one (batch-block, spatial-tile) block of the 1x1 conv.
#   x_ref : (Bblk, Cin, TN)   channels in sublanes, spatial in lanes
#   w_ref : (Cout, Cin)       replicated across the grid
#   b_ref : (Cout, 1)         replicated across the grid
#   o_ref : (Bblk, Cout, TN)  lane-dense output tile
# ----------------------------------------------------------------------------
def _pfc_kernel(x_ref, w_ref, b_ref, o_ref):
    w = w_ref[...]
    bias = b_ref[...]
    # Bblk is a small static Python int -> fully unrolled; each iteration is one
    # (Cout,Cin)x(Cin,TN) MXU matmul followed by a lane-dense store.
    for i in range(x_ref.shape[0]):
        y = jnp.dot(
            w,
            x_ref[i],
            preferred_element_type=jnp.float32,
            precision=jax.lax.Precision.HIGHEST,
        )
        o_ref[i] = (y + bias).astype(o_ref.dtype)


# ----------------------------------------------------------------------------
# VMEM-aware blocking.
# ----------------------------------------------------------------------------
def _vmem_capacity_bytes():
    try:
        return int(pltpu.get_tpu_info().vmem_capacity_bytes)
    except Exception:
        return 64 << 20  # conservative: v7x physical VMEM per TensorCore


def _choose_blocking(B, Cin, Cout, HWp, itemsize, budget):
    """Pick (Bblk, TN) so double-buffered in+out blocks fit `budget` and per-step
    input bytes are large enough to amortize the ~0.35us/step grid overhead."""

    def blk_bytes(bblk, tn):
        # double-buffered input + output blocks
        return 2 * bblk * (Cin + Cout) * tn * itemsize

    total_in = B * Cin * HWp * itemsize
    if blk_bytes(B, HWp) <= budget and total_in <= (4 << 20):
        # Tiny problem: one grid step for the whole tensor.
        return B, HWp

    target_in = 4 << 20  # ~4 MiB input block per step keeps the DMA engine busy
    tn_divs = [t for t in range(HWp, 127, -128) if HWp % t == 0]   # large -> small
    b_divs = sorted(d for d in range(1, B + 1) if B % d == 0)      # small -> large

    best = (0, 1, 128)
    for bblk in b_divs:
        for tn in tn_divs:  # first hit = largest TN that fits VMEM for this bblk
            if blk_bytes(bblk, tn) <= budget:
                in_bytes = bblk * Cin * tn * itemsize
                if in_bytes > best[0]:
                    best = (in_bytes, bblk, tn)
                if in_bytes >= target_in:
                    return bblk, tn
                break
    return best[1], best[2]


# ----------------------------------------------------------------------------
# Wrapper: NCHW in, NCHW out.
# ----------------------------------------------------------------------------
def pfc_forward(x_nchw, w_oihw, bias):
    B, Cin, H, W = x_nchw.shape
    Cout = w_oihw.shape[0]
    HW = H * W
    itemsize = jnp.dtype(x_nchw.dtype).itemsize

    # Tail-pad flattened spatial dim to a multiple of 128 (lane-dense tiles).
    HWp = ((HW + 127) // 128) * 128
    x = x_nchw.reshape(B, Cin, HW)
    if HWp != HW:
        x = jnp.pad(x, ((0, 0), (0, 0), (0, HWp - HW)))

    vmem_cap = _vmem_capacity_bytes()
    budget = vmem_cap // 4  # keep pipelined blocks well inside VMEM on every generation
    Bblk, TN = _choose_blocking(B, Cin, Cout, HWp, itemsize, budget)

    w2 = w_oihw.reshape(Cout, Cin)
    b2 = bias.reshape(Cout, 1)

    block_bytes = (
        2 * Bblk * (Cin + Cout) * TN * itemsize + 2 * (Cout * Cin + Cout) * itemsize
    )
    vmem_limit = int(min(vmem_cap, max(32 << 20, block_bytes + (8 << 20))))

    cost = pl.CostEstimate(
        flops=2 * B * Cout * Cin * HW,
        transcendentals=0,
        bytes_accessed=(B * Cin * HW + B * Cout * HW + Cout * Cin + Cout) * itemsize,
    )

    out = pl.pallas_call(
        _pfc_kernel,
        out_shape=jax.ShapeDtypeStruct((B, Cout, HWp), x_nchw.dtype),
        grid_spec=pltpu.PrefetchScalarGridSpec(
            num_scalar_prefetch=0,
            grid=(B // Bblk, HWp // TN),
            in_specs=[
                pl.BlockSpec((Bblk, Cin, TN), lambda b, j: (b, 0, j)),
                pl.BlockSpec((Cout, Cin), lambda b, j: (0, 0)),
                pl.BlockSpec((Cout, 1), lambda b, j: (0, 0)),
            ],
            out_specs=pl.BlockSpec((Bblk, Cout, TN), lambda b, j: (b, 0, j)),
        ),
        compiler_params=pltpu.CompilerParams(
            dimension_semantics=("parallel", "parallel"),
            vmem_limit_bytes=vmem_limit,
        ),
        cost_estimate=cost,
    )(x, w2, b2)

    if HWp != HW:
        out = out[:, :, :HW]
    return out.reshape(B, Cout, H, W)


# ----------------------------------------------------------------------------
# Deterministic parameter init matching nn.Conv2d defaults (uniform +-1/sqrt(fan_in)).
# ----------------------------------------------------------------------------
def make_params(in_channels, compression_ratio=0.125, seed=0):
    out_channels = int(in_channels * compression_ratio)
    fan_in = in_channels  # 1x1 kernel
    bound = 1.0 / math.sqrt(fan_in)
    kw, kb = jax.random.split(jax.random.PRNGKey(seed))
    w = jax.random.uniform(
        kw, (out_channels, in_channels, 1, 1), jnp.float32, -bound, bound
    )
    b = jax.random.uniform(kb, (out_channels,), jnp.float32, -bound, bound)
    return w, b


# ----------------------------------------------------------------------------
# Pure-JAX reference (matches the PyTorch forward: a single 1x1 conv).
# ----------------------------------------------------------------------------
def ref_forward(x, w, b):
    dn = ("NCHW", "OIHW", "NCHW")
    y = jax.lax.conv_general_dilated(x, w, (1, 1), "SAME", dimension_numbers=dn)
    return y + b[None, :, None, None]


if __name__ == "__main__":
    B, Cin, H, W = 2, 32, 16, 16          # Cout = int(32 * 0.125) = 4
    w, b = make_params(in_channels=Cin, compression_ratio=0.125, seed=0)

    x = jax.random.normal(jax.random.PRNGKey(0), (B, Cin, H, W), jnp.float32)
    out = jax.block_until_ready(pfc_forward(x, w, b))
    ref = ref_forward(x, w, b)
    assert out.shape == ref.shape == (B, 4, H, W), (out.shape, ref.shape)
    err = float(jnp.max(jnp.abs(out - ref)))
    if err > 1e-3:
        raise AssertionError(f"Pallas kernel mismatch vs reference: max abs err = {err}")

    # Exercise the non-128-multiple spatial path (HW=225 -> padded to 256).
    x2 = jax.random.normal(jax.random.PRNGKey(1), (B, Cin, 15, 15), jnp.float32)
    out2 = jax.block_until_ready(pfc_forward(x2, w, b))
    ref2 = ref_forward(x2, w, b)
    err2 = float(jnp.max(jnp.abs(out2 - ref2)))
    if err2 > 1e-3:
        raise AssertionError(f"Pallas kernel mismatch (padded path): max abs err = {err2}")

    print("KERNEL_OK")
</pallas_src>

<mosaic_0001>
module attributes {stable_mosaic.version = 11 : i64} {
  func.func @_pfc_kernel(%arg0: i32, %arg1: i32, %arg2: memref<2x32x256xf32, #tpu.memory_space<vmem>>, %arg3: memref<4x32xf32, #tpu.memory_space<vmem>>, %arg4: memref<4x1xf32, #tpu.memory_space<vmem>>, %arg5: memref<2x4x256xf32, #tpu.memory_space<vmem>>) attributes {dimension_semantics = [#tpu.dimension_semantics<parallel>, #tpu.dimension_semantics<parallel>], iteration_bounds = array<i64: 1, 1>, scalar_prefetch = 0 : i64, scratch_operands = 0 : i64, tpu.core_type = #tpu.core_type<tc>, window_params = [{transform_indices = @transform_0, window_bounds = array<i64: 2, 32, 256>}, {pipeline_mode = #tpu.pipeline_mode<synchronous>, transform_indices = @transform_1, window_bounds = array<i64: 4, 32>}, {pipeline_mode = #tpu.pipeline_mode<synchronous>, transform_indices = @transform_2, window_bounds = array<i64: 4, 1>}, {transform_indices = @transform_3, window_bounds = array<i64: 2, 4, 256>}]} {
    %c0 = arith.constant 0 : index
    %c0_0 = arith.constant 0 : index
    %0 = vector.load %arg3[%c0, %c0_0] : memref<4x32xf32, #tpu.memory_space<vmem>>, vector<4x32xf32>
    %c0_1 = arith.constant 0 : index
    %c0_2 = arith.constant 0 : index
    %1 = vector.load %arg4[%c0_1, %c0_2] : memref<4x1xf32, #tpu.memory_space<vmem>>, vector<4x1xf32>
    %c0_3 = arith.constant 0 : index
    %c0_4 = arith.constant 0 : index
    %c0_5 = arith.constant 0 : index
    %2 = vector.load %arg2[%c0_3, %c0_4, %c0_5] : memref<2x32x256xf32, #tpu.memory_space<vmem>>, vector<1x32x256xf32>
    %3 = vector.shape_cast %2 : vector<1x32x256xf32> to vector<32x256xf32>
    %cst = arith.constant dense<0.000000e+00> : vector<4x256xf32>
    %4 = tpu.matmul %0, %3, %cst {dimension_numbers = #tpu.dot_dimension_numbers<[1], [0], [0], [1], [0, 0, 1, 1], [], []>, precision = #tpu.contract_precision<fp32>} : vector<4x32xf32>, vector<32x256xf32>, vector<4x256xf32> -> vector<4x256xf32>
    %5 = vector.broadcast %1 : vector<4x1xf32> to vector<4x256xf32>
    %6 = arith.addf %4, %5 : vector<4x256xf32>
    %c0_6 = arith.constant 0 : index
    %c0_7 = arith.constant 0 : index
    %c0_8 = arith.constant 0 : index
    %7 = vector.load %arg5[%c0_6, %c0_7, %c0_8] : memref<2x4x256xf32, #tpu.memory_space<vmem>>, vector<1x4x256xf32>
    %8 = vector.shape_cast %7 : vector<1x4x256xf32> to vector<4x256xf32>
    %9 = vector.shape_cast %6 : vector<4x256xf32> to vector<1x4x256xf32>
    tpu.vector_store %arg5[%c0_6, %c0_7, %c0_8], %9 {strides = array<i32>} : memref<2x4x256xf32, #tpu.memory_space<vmem>>, vector<1x4x256xf32>,
    %c1 = arith.constant 1 : index
    %c0_9 = arith.constant 0 : index
    %c0_10 = arith.constant 0 : index
    %10 = vector.load %arg2[%c1, %c0_9, %c0_10] : memref<2x32x256xf32, #tpu.memory_space<vmem>>, vector<1x32x256xf32>
    %11 = vector.shape_cast %10 : vector<1x32x256xf32> to vector<32x256xf32>
    %cst_11 = arith.constant dense<0.000000e+00> : vector<4x256xf32>
    %12 = tpu.matmul %0, %11, %cst_11 {dimension_numbers = #tpu.dot_dimension_numbers<[1], [0], [0], [1], [0, 0, 1, 1], [], []>, precision = #tpu.contract_precision<fp32>} : vector<4x32xf32>, vector<32x256xf32>, vector<4x256xf32> -> vector<4x256xf32>
    %13 = vector.broadcast %1 : vector<4x1xf32> to vector<4x256xf32>
    %14 = arith.addf %12, %13 : vector<4x256xf32>
    %c1_12 = arith.constant 1 : index
    %c0_13 = arith.constant 0 : index
    %c0_14 = arith.constant 0 : index
    %15 = vector.load %arg5[%c1_12, %c0_13, %c0_14] : memref<2x4x256xf32, #tpu.memory_space<vmem>>, vector<1x4x256xf32>
    %16 = vector.shape_cast %15 : vector<1x4x256xf32> to vector<4x256xf32>
    %17 = vector.shape_cast %14 : vector<4x256xf32> to vector<1x4x256xf32>
    tpu.vector_store %arg5[%c1_12, %c0_13, %c0_14], %17 {strides = array<i32>} : memref<2x4x256xf32, #tpu.memory_space<vmem>>, vector<1x4x256xf32>,
    return
  }
  func.func @transform_0(%arg0: i32, %arg1: i32) -> (i32, i32, i32) {
    %c0_i32 = arith.constant 0 : i32
    %c0_i32_0 = arith.constant 0 : i32
    return %arg0, %c0_i32, %arg1 : i32, i32, i32
  }
  func.func @transform_1(%arg0: i32, %arg1: i32) -> (i32, i32) {
    %c0_i32 = arith.constant 0 : i32
    %c0_i32_0 = arith.constant 0 : i32
    %c0_i32_1 = arith.constant 0 : i32
    return %c0_i32, %c0_i32_0 : i32, i32
  }
  func.func @transform_2(%arg0: i32, %arg1: i32) -> (i32, i32) {
    %c0_i32 = arith.constant 0 : i32
    %c0_i32_0 = arith.constant 0 : i32
    %c0_i32_1 = arith.constant 0 : i32
    return %c0_i32, %c0_i32_0 : i32, i32
  }
  func.func @transform_3(%arg0: i32, %arg1: i32) -> (i32, i32, i32) {
    %c0_i32 = arith.constant 0 : i32
    %c0_i32_0 = arith.constant 0 : i32
    return %arg0, %c0_i32, %arg1 : i32, i32, i32
  }
}

</mosaic_0001>

<bundles_post_ra>
// kernel: tpu_custom_call.1
= control target key start
LH: loop header
LB: loop body
LE: loop exit
PB: predicated region body
PF: predicated region fallthrough
CT: control target
= control target key end

     0   :  { %8 = vsyncpa [#allocation3], 0  ;;  %s1533_s0 = inlined_call_operand.hbm [shape: f32[2,32,256], index: 0, kind: input, shape index: {}]   ;;  %s1534_s1 = inlined_call_operand.vmem [shape: f32[4,32], index: 1, kind: input, shape index: {}]   ;;  %s1535_s2 = inlined_call_operand.vmem [shape: f32[4,1], index: 2, kind: input, shape index: {}]   ;;  %s1536_s3 = inlined_call_operand.hbm [shape: f32[2,4,256], index: 3, kind: output, shape index: {}]  }
   0x1   :  { %9 = vsyncpa [#allocation4], 0  ;;  %s1224_s12 = smov [#allocation2]  }
   0x2   :  { %s15_s13 = sshll.u32 %s1224_s12, 4  ;;  %s16_s13 = int_to_ptr.vmem [resolvable:$true] %s15_s13 }
   0x3   :  { %s1188_s14 = scalar_lea.vmem %s16_s13, 2048  ;;  %p1193_p1 = scmp.lt.s32.totalorder %s16_s13, %s16_s13 }
   0x4   :  { %p1189_p0 = scmp.ne.s32.totalorder %s16_s13, %s1188_s14  ;;  %p1194_p2 = scmp.lt.s32.totalorder %s1188_s14, %s1188_s14 }
   0x6   :  { %p1195_p3 = por %p1194_p2, %p1193_p1 }
   0x8   :  { %p1196_p4 = pnand %p1195_p3, %p1189_p0 }
   0xa   :  { %1199 = shalt.err (!%p1196_p4)
}
   0xb   :  { %s1225_s15 = smov 256   ;;  %s1226_s16 = smov 16  }
   0xc   :  { %21 = dma.hbm_to_vmem [thread:$0]  %s1533_s0, 2048, %s16_s13, [#allocation3], %s1225_s15, %s1225_s15, %s1226_s16  }
   0xd   :  { %1220 = dma.done.wait [#allocation3], 2048  }
   0xe   :  { %1221 = vsyncadd [#allocation3], 4294965248  ;;  %v1227_v0 = vmov 0.0   ;;  %v1228_v1 = vmov 0   ;;  %v38_v2 = vld [vmem:[#allocation2 + $0x38] sm:$0xff]  ;;  %v37_v3 = vld [vmem:[#allocation2 + $0x30] sm:$0xff] }
   0xf   :  { %120 = vmatprep.mubr.f32.mxu0 %v1227_v0  ;;  %236 = vmatprep.mubr.f32.mxu1 %v1227_v0  ;;  %v36_v4 = vld [vmem:[#allocation2 + $0x28] sm:$0xff]  ;;  %vm44_vm0 = vcmask 261120   ;;  %v1257_v5 = vand.u32 4294901760, %v38_v2  ;;  %v1259_v6 = vand.u32 4294901760, %v37_v3  ;;  %v35_v8 = vld [vmem:[#allocation2 + $0x20] sm:$0xff]  ;;  %v34_v9 = vld [vmem:[#allocation2 + $0x18] sm:$0xff] }
  0x10   :  { %1179 = vset.pattern.permute.xlu0 %v1228_v1  ;;  %v1261_v7 = vand.u32 4294901760, %v36_v4  ;;  %v33_v10 = vld [vmem:[#allocation2 + $0x10] sm:$0xff]  ;;  %v1263_v11 = vand.u32 4294901760, %v35_v8  ;;  %v1265_v12 = vand.u32 4294901760, %v34_v9  ;;  %v32_v14 = vld [vmem:[#allocation2 + $0x8] sm:$0xff]  ;;  %v31_v15 = vld [vmem:[#allocation2] sm:$0xff] }
  0x11   :  { %v1267_v13 = vand.u32 4294901760, %v33_v10  ;;  %73 = vmatprep.subr.mxu0 %v1257_v5  ;;  %v1270_v16 = vand.u32 4294901760, %v32_v14  ;;  %v1273_v17 = vsub.f32 %v38_v2, %v1257_v5  ;;  %v1275_v18 = vand.u32 4294901760, %v31_v15  ;;  %v29_v20 = vld [vmem:[%s1534_s1] sm:$0xf]  ;;  %v604_v58 = vld [vmem:[#allocation2 + $0x78] sm:$0xff] }
  0x12   :  { %v1278_v19 = vsub.f32 %v37_v3, %v1259_v6  ;;  %75 = vmatpush1.msra.mxu0 %v1259_v6  ;;  %v1285_v21 = vsub.f32 %v36_v4, %v1261_v7  ;;  %v46_v22 = vsel %vm44_vm0, %v29_v20, 0  ;;  %v1289_v23 = vsub.f32 %v35_v8, %v1263_v11  ;;  %v30_v33 = vld [vmem:[%s1535_s2] sm:$0xf]  ;;  %v603_v59 = vld [vmem:[#allocation2 + $0x70] sm:$0xff]  ;;  %v602_v60 = vld [vmem:[#allocation2 + $0x68] sm:$0xff]  ;;  %s1229_s2 = smov [#allocation5]  }
  0x13   :  { %v1292_v24 = vsub.f32 %v34_v9, %v1265_v12  ;;  %77 = vmatprep.subr.mxu0 %v1261_v7  ;;  %v158_v25 = vand.u32 4294901760, %v1273_v17  ;;  %v1297_v27 = vand.u32 4294901760, %v46_v22  ;;  %v1300_v28 = vsub.f32 %v33_v10, %v1267_v13  ;;  %41 = vperm.xlu0 %1179, %v30_v33   ;;  %v601_v62 = vld [vmem:[#allocation2 + $0x60] sm:$0xff]  ;;  %v600_v1 = vld [vmem:[#allocation2 + $0x58] sm:$0xff]  ;;  %v599_v3 = vld [vmem:[#allocation2 + $0x50] sm:$0xff]  ;;  %s1159_s21 = sshll.u32 %s1229_s2, 4  ;;  %s1160_s21 = int_to_ptr.vmem [resolvable:$true] %s1159_s21 }
  0x14   :  { %v164_v26 = vand.u32 4294901760, %v1278_v19  ;;  %79 = vmatpush1.msra.mxu0 %v1263_v11  ;;  %v170_v29 = vand.u32 4294901760, %v1285_v21  ;;  %v176_v30 = vand.u32 4294901760, %v1289_v23  ;;  %v1307_v32 = vsub.f32 %v32_v14, %v1270_v16  ;;  %v598_v8 = vld [vmem:[#allocation2 + $0x48] sm:$0xff]  ;;  %v597_v14 = vld [vmem:[#allocation2 + $0x40] sm:$0xff]  ;;  %s1200_s22 = scalar_lea.vmem %s1160_s21, 256  ;;  %p1205_p6 = scmp.lt.s32.totalorder %s1160_s21, %s1160_s21 }
  0x15   :  { %v182_v31 = vand.u32 4294901760, %v1292_v24  ;;  %81 = vmatprep.subr.mxu0 %v1265_v12  ;;  %v159_v34 = vsub.f32 %v1273_v17, %v158_v25  ;;  %v1320_v36 = vsub.f32 %v46_v22, %v1297_v27  ;;  %v188_v37 = vand.u32 4294901760, %v1300_v28  ;;  %p1201_p5 = scmp.ne.s32.totalorder %s1160_s21, %s1200_s22  ;;  %p1206_p7 = scmp.lt.s32.totalorder %s1200_s22, %s1200_s22 }
  0x16   :  { %v165_v35 = vsub.f32 %v1278_v19, %v164_v26  ;;  %83 = vmatpush1.msra.mxu0 %v1267_v13  ;;  %v171_v38 = vsub.f32 %v1285_v21, %v170_v29  ;;  %v177_v39 = vsub.f32 %v1289_v23, %v176_v30  ;;  %v194_v41 = vand.u32 4294901760, %v1307_v32 }
  0x17   :  { %v183_v40 = vsub.f32 %v1292_v24, %v182_v31  ;;  %85 = vmatprep.subr.mxu0 %v1270_v16  ;;  %v160_v42 = vand.u32 4294901760, %v159_v34  ;;  %v1336_v44 = vand.u32 4294901760, %v1320_v36  ;;  %v189_v45 = vsub.f32 %v1300_v28, %v188_v37  ;;  %p1207_p8 = por %p1206_p7, %p1205_p6 }
  0x18   :  { %v166_v43 = vand.u32 4294901760, %v165_v35  ;;  %87 = vmatpush1.msra.mxu0 %v1275_v18  ;;  %v172_v46 = vand.u32 4294901760, %v171_v38  ;;  %v178_v47 = vand.u32 4294901760, %v177_v39  ;;  %v195_v48 = vsub.f32 %v1307_v32, %v194_v41 }
  0x19   :  { %161 = vmatprep.subr.mxu1 %v160_v42  ;;  %270 = vmatprep.subr.mxu0 %v1273_v17  ;;  %v124_v49 = vsub.f32 %v1320_v36, %v1336_v44  ;;  %v184_v50 = vand.u32 4294901760, %v183_v40  ;;  %v1349_v51 = vsub.f32 %v31_v15, %v1275_v18  ;;  %v190_v52 = vand.u32 4294901760, %v189_v45  ;;  %p1208_p9 = pnand %p1207_p8, %p1201_p5 }
  0x1a   :  { %167 = vmatpush1.msra.mxu1 %v166_v43  ;;  %v196_v54 = vand.u32 4294901760, %v195_v48  ;;  %v1365_v61 = vand.u32 4294901760, %v604_v58  ;;  %v1369_v63 = vand.u32 4294901760, %v603_v59  ;;  %v1373_v2 = vand.u32 4294901760, %v602_v60 }
  0x1b   :  { %173 = vmatprep.subr.mxu1 %v172_v46  ;;  %v1351_v53 = vand.u32 4294901760, %v124_v49  ;;  %v200_v55 = vand.u32 4294901760, %v1349_v51  ;;  %v1378_v4 = vand.u32 4294901760, %v601_v62  ;;  %v1383_v9 = vand.u32 4294901760, %v600_v1 }
  0x1c   :  { %179 = vmatpush1.msra.mxu1 %v178_v47  ;;  %v1386_v10 = vsub.f32 %v604_v58, %v1365_v61  ;;  %v1392_v15 = vsub.f32 %v603_v59, %v1369_v63  ;;  %v1394_v17 = vand.u32 4294901760, %v599_v3  ;;  %v1402_v20 = vsub.f32 %v602_v60, %v1373_v2 }
  0x1d   :  { %126 = vmatmul.mubr.f32.vlgmr.msra.gmra.mxu0 %v1351_v53  ;;  %185 = vmatprep.subr.mxu1 %v184_v50  ;;  %v201_v56 = vsub.f32 %v1349_v51, %v200_v55  ;;  %v1410_v22 = vand.u32 4294901760, %v597_v14 }
  0x1e   :  { %273 = vmatpush1.msra.mxu0 %v1278_v19  ;;  %191 = vmatpush1.msra.mxu1 %v190_v52  ;;  %v1399_v19 = vand.u32 4294901760, %v598_v8 }
  0x1f   :  { %276 = vmatprep.subr.mxu0 %v1285_v21  ;;  %197 = vmatprep.subr.mxu1 %v196_v54  ;;  %v202_v57 = vand.u32 4294901760, %v201_v56  ;;  %v1408_v21 = vsub.f32 %v601_v62, %v1378_v4 }
  0x20   :  { %279 = vmatpush1.msra.mxu0 %v1289_v23  ;;  %324 = vmatprep.mubr.f32.mxu0 %v1227_v0  ;;  %v715_v23 = vand.u32 4294901760, %v1386_v10 }
  0x21   :  { %282 = vmatprep.subr.mxu0 %v1292_v24  ;;  %203 = vmatpush1.msra.mxu1 %v202_v57  ;;  %v1423_v24 = vsub.f32 %v599_v3, %v1394_v17 }
  0x22   :  { %285 = vmatpush1.msra.mxu0 %v1300_v28  ;;  %238 = vmatmul.mubr.f32.vlgmr.msra.gmra.mxu1 %v1297_v27  ;;  %v727_v28 = vand.u32 4294901760, %v1402_v20 }
  0x23   :  { %288 = vmatprep.subr.mxu0 %v1307_v32  ;;  %358 = vmatprep.subr.mxu1 %v1257_v5  ;;  %v745_v33 = vand.u32 4294901760, %v1423_v24 }
  0x24   :  { %291 = vmatpush1.msra.mxu0 %v1349_v51  ;;  %360 = vmatpush1.msra.mxu1 %v1259_v6 }
  0x25   :  { %327 = vmatmul.mubr.f32.vlgmr.msra.gmra.mxu0 %v1320_v36  ;;  %362 = vmatprep.subr.mxu1 %v1261_v7  ;;  %v746_v38 = vsub.f32 %v1423_v24, %v745_v33 }
  0x26   :  { %442 = vmatprep.subr.mxu0 %v158_v25  ;;  %364 = vmatpush1.msra.mxu1 %v1263_v11  ;;  %v1417_v25 = vsub.f32 %v600_v1, %v1383_v9 }
  0x27   :  { %446 = vmatpush1.msra.mxu0 %v164_v26  ;;  %366 = vmatprep.subr.mxu1 %v1265_v12  ;;  %v721_v26 = vand.u32 4294901760, %v1392_v15  ;;  %v747_v42 = vand.u32 4294901760, %v746_v38 }
  0x28   :  { %450 = vmatprep.subr.mxu0 %v170_v29  ;;  %368 = vmatpush1.msra.mxu1 %v1267_v13  ;;  %v1429_v29 = vsub.f32 %v598_v8, %v1399_v19  ;;  %v739_v32 = vand.u32 4294901760, %v1417_v25 }
  0x29   :  { %454 = vmatpush1.msra.mxu0 %v176_v30  ;;  %370 = vmatprep.subr.mxu1 %v1270_v16  ;;  %v1434_v30 = vsub.f32 %v597_v14, %v1410_v22 }
  0x2a   :  { %458 = vmatprep.subr.mxu0 %v182_v31  ;;  %372 = vmatpush1.msra.mxu1 %v1275_v18  ;;  %v733_v31 = vand.u32 4294901760, %v1408_v21  ;;  %v751_v34 = vand.u32 4294901760, %v1429_v29 }
  0x2b   :  { %405 = vmatprep.mubr.f32.mxu1 %v1227_v0  ;;  %462 = vmatpush1.msra.mxu0 %v188_v37  ;;  %v757_v35 = vand.u32 4294901760, %v1434_v30  ;;  %v740_v37 = vsub.f32 %v1417_v25, %v739_v32 }
  0x2c   :  { %409 = vmatmul.mubr.f32.vlgmr.msra.gmra.mxu1 %v1336_v44  ;;  %466 = vmatprep.subr.mxu0 %v194_v41 }
  0x2d   :  { %536 = vmatprep.subr.mxu1 %v1257_v5  ;;  %470 = vmatpush1.msra.mxu0 %v200_v55  ;;  %v716_v5 = vsub.f32 %v1386_v10, %v715_v23  ;;  %v741_v41 = vand.u32 4294901760, %v740_v37 }
  0x2e   :  { %503 = vmatprep.mubr.f32.mxu0 %v1227_v0  ;;  %538 = vmatpush1.msra.mxu1 %v1259_v6  ;;  %v722_v6 = vsub.f32 %v1392_v15, %v721_v26 }
  0x2f   :  { %505 = vmatmul.mubr.f32.vlgmr.msra.gmra.mxu0 %v1297_v27  ;;  %540 = vmatprep.subr.mxu1 %v1261_v7  ;;  %v728_v7 = vsub.f32 %v1402_v20, %v727_v28 }
  0x30   :  { %630 = vmatprep.subr.mxu0 %v1365_v61  ;;  %542 = vmatpush1.msra.mxu1 %v1263_v11  ;;  %v734_v11 = vsub.f32 %v1408_v21, %v733_v31 }
  0x31   :  { %632 = vmatpush1.msra.mxu0 %v1369_v63  ;;  %544 = vmatprep.subr.mxu1 %v1265_v12  ;;  %v717_v12 = vand.u32 4294901760, %v716_v5  ;;  %v729_v39 = vand.u32 4294901760, %v728_v7 }
  0x32   :  { %634 = vmatprep.subr.mxu0 %v1373_v2  ;;  %546 = vmatpush1.msra.mxu1 %v1267_v13  ;;  %v723_v13 = vand.u32 4294901760, %v722_v6  ;;  %v735_v40 = vand.u32 4294901760, %v734_v11 }
  0x33   :  { %636 = vmatpush1.msra.mxu0 %v1378_v4  ;;  %548 = vmatprep.subr.mxu1 %v1270_v16  ;;  %v752_v16 = vsub.f32 %v1429_v29, %v751_v34 }
  0x34   :  { %638 = vmatprep.subr.mxu0 %v1383_v9  ;;  %550 = vmatpush1.msra.mxu1 %v1275_v18  ;;  %v758_v18 = vsub.f32 %v1434_v30, %v757_v35 }
  0x35   :  { %583 = vmatprep.mubr.f32.mxu1 %v1227_v0  ;;  %640 = vmatpush1.msra.mxu0 %v1394_v17  ;;  %v753_v43 = vand.u32 4294901760, %v752_v16 }
  0x36   :  { %585 = vmatmul.mubr.f32.vlgmr.msra.gmra.mxu1 %v1297_v27  ;;  %642 = vmatprep.subr.mxu0 %v1399_v19  ;;  %v759_v45 = vand.u32 4294901760, %v758_v18 }
  0x37   :  { %718 = vmatprep.subr.mxu1 %v717_v12  ;;  %644 = vmatpush1.msra.mxu0 %v1410_v22 }
  0x38   :  { %724 = vmatpush1.msra.mxu1 %v723_v13  ;;  %677 = vmatprep.mubr.f32.mxu0 %v1227_v0 }
  0x39   :  { %730 = vmatprep.subr.mxu1 %v729_v39  ;;  %827 = vmatprep.subr.mxu0 %v1386_v10 }
  0x3a   :  { %683 = vmatmul.mubr.f32.vlgmr.msra.gmra.mxu0 %v1351_v53  ;;  %736 = vmatpush1.msra.mxu1 %v735_v40 }
  0x3b   :  { %830 = vmatpush1.msra.mxu0 %v1392_v15  ;;  %742 = vmatprep.subr.mxu1 %v741_v41 }
  0x3c   :  { %833 = vmatprep.subr.mxu0 %v1402_v20  ;;  %748 = vmatpush1.msra.mxu1 %v747_v42 }
  0x3d   :  { %836 = vmatpush1.msra.mxu0 %v1408_v21  ;;  %754 = vmatprep.subr.mxu1 %v753_v43 }
  0x3e   :  { %839 = vmatprep.subr.mxu0 %v1417_v25  ;;  %760 = vmatpush1.msra.mxu1 %v759_v45 }
  0x3f   :  { %793 = vmatprep.mubr.f32.mxu1 %v1227_v0  ;;  %842 = vmatpush1.msra.mxu0 %v1423_v24 }
  0x40   :  { %795 = vmatmul.mubr.f32.vlgmr.msra.gmra.mxu1 %v1297_v27  ;;  %845 = vmatprep.subr.mxu0 %v1429_v29 }
  0x41   :  { %915 = vmatprep.subr.mxu1 %v1365_v61  ;;  %848 = vmatpush1.msra.mxu0 %v1434_v30 }
  0x42   :  { %881 = vmatprep.mubr.f32.mxu0 %v1227_v0  ;;  %917 = vmatpush1.msra.mxu1 %v1369_v63 }
  0x43   :  { %884 = vmatmul.mubr.f32.vlgmr.msra.gmra.mxu0 %v1320_v36  ;;  %919 = vmatprep.subr.mxu1 %v1373_v2 }
  0x44   :  { %999 = vmatprep.subr.mxu0 %v715_v23  ;;  %921 = vmatpush1.msra.mxu1 %v1378_v4 }
  0x45   :  { %1003 = vmatpush1.msra.mxu0 %v721_v26  ;;  %923 = vmatprep.subr.mxu1 %v1383_v9 }
  0x46   :  { %1007 = vmatprep.subr.mxu0 %v727_v28  ;;  %925 = vmatpush1.msra.mxu1 %v1394_v17 }
  0x47   :  { %1011 = vmatpush1.msra.mxu0 %v733_v31  ;;  %927 = vmatprep.subr.mxu1 %v1399_v19 }
  0x48   :  { %1015 = vmatprep.subr.mxu0 %v739_v32  ;;  %929 = vmatpush1.msra.mxu1 %v1410_v22 }
  0x49   :  { %962 = vmatprep.mubr.f32.mxu1 %v1227_v0  ;;  %1019 = vmatpush1.msra.mxu0 %v745_v33 }
  0x4a   :  { %966 = vmatmul.mubr.f32.vlgmr.msra.gmra.mxu1 %v1336_v44  ;;  %1023 = vmatprep.subr.mxu0 %v751_v34 }
  0x4b   :  { %1093 = vmatprep.subr.mxu1 %v1365_v61  ;;  %1027 = vmatpush1.msra.mxu0 %v757_v35 }
  0x4c   :  { %1060 = vmatprep.mubr.f32.mxu0 %v1227_v0  ;;  %1095 = vmatpush1.msra.mxu1 %v1369_v63 }
  0x4d   :  { %1062 = vmatmul.mubr.f32.vlgmr.msra.gmra.mxu0 %v1297_v27  ;;  %1097 = vmatprep.subr.mxu1 %v1373_v2 }
  0x4e   :  { %1099 = vmatpush1.msra.mxu1 %v1378_v4  ;;  %1140 = vmatprep.mubr.f32.mxu1 %v1227_v0 }
  0x4f   :  { %1101 = vmatprep.subr.mxu1 %v1383_v9 }
  0x50   :  { %1103 = vmatpush1.msra.mxu1 %v1394_v17 }
  0x51   :  { %1105 = vmatprep.subr.mxu1 %v1399_v19 }
  0x52   :  { %1107 = vmatpush1.msra.mxu1 %v1410_v22 }
  0x53   :  { %1142 = vmatmul.mubr.f32.vlgmr.msra.gmra.mxu1 %v1297_v27 }
  0x8e   :  { %v42_v44 = vpop.permute.xlu0 %41 }
  0xdd   :  { %v127_v36 = vpop.f32.mrf.mxu0 }
  0xde   :  { %v128_v49 = vadd.f32 %v127_v36, %v42_v44 }
  0xdf   :  { %v129_v46 = vpop.f32.mrf.mxu0 }
  0xe0   :  { %v130_v48 = vadd.f32 %v129_v46, %v42_v44 }
  0xe2   :  { %v239_v47 = vpop.f32.mrf.mxu1 }
  0xe3   :  { %v240_v0 = vadd.f32 %v239_v47, %v128_v49 }
  0xe4   :  { %v241_v50 = vpop.f32.mrf.mxu1 }
  0xe5   :  { %v328_v51 = vpop.f32.mrf.mxu0  ;;  %v242_v53 = vadd.f32 %v241_v50, %v130_v48 }
  0xe6   :  { %v329_v57 = vadd.f32 %v328_v51, %v240_v0 }
  0xe7   :  { %v330_v54 = vpop.f32.mrf.mxu0 }
  0xe8   :  { %v331_v58 = vadd.f32 %v330_v54, %v242_v53 }
  0xec   :  { %v410_v52 = vpop.f32.mrf.mxu1 }
  0xed   :  { %v411_v59 = vadd.f32 %v410_v52, %v329_v57 }
  0xee   :  { %v412_v55 = vpop.f32.mrf.mxu1 }
  0xef   :  { %v506_v56 = vpop.f32.mrf.mxu0  ;;  %v413_v60 = vadd.f32 %v412_v55, %v331_v58 }
  0xf0   :  { %v507_v62 = vadd.f32 %v506_v56, %v411_v59 }
  0xf1   :  { %v508_v61 = vpop.f32.mrf.mxu0 }
  0xf2   :  { %v509_v63 = vadd.f32 %v508_v61, %v413_v60 }
  0xf6   :  { %v586_v27 = vpop.f32.mrf.mxu1 }
  0xf7   :  { %v587_v2 = vadd.f32 %v586_v27, %v507_v62 }
  0xf8   :  { %v588_v1 = vpop.f32.mrf.mxu1 }
  0xf9   :  { %v589_v3 = vadd.f32 %v588_v1, %v509_v63 }
  0xfa   :  { %v684_v8 = vpop.f32.mrf.mxu0 }
  0xfb   :  { %v593_v4 = vcombine.low %v587_v2, %v589_v3  ;;  %v685_v14 = vadd.f32 %v684_v8, %v42_v44 }
  0xfc   :  { %v686_v9 = vpop.f32.mrf.mxu0 }
  0xfd   :  { %595 = vst [vmem:[#allocation5] sm:$0xff] %v593_v4  ;;  %v687_v15 = vadd.f32 %v686_v9, %v42_v44 }
 0x100   :  { %v796_v10 = vpop.f32.mrf.mxu1 }
 0x101   :  { %v797_v20 = vadd.f32 %v796_v10, %v685_v14 }
 0x102   :  { %v798_v17 = vpop.f32.mrf.mxu1 }
 0x103   :  { %v885_v19 = vpop.f32.mrf.mxu0  ;;  %v799_v21 = vadd.f32 %v798_v17, %v687_v15 }
 0x104   :  { %v886_v26 = vadd.f32 %v885_v19, %v797_v20 }
 0x105   :  { %v887_v23 = vpop.f32.mrf.mxu0 }
 0x106   :  { %v888_v28 = vadd.f32 %v887_v23, %v799_v21 }
 0x10a   :  { %v967_v22 = vpop.f32.mrf.mxu1 }
 0x10b   :  { %v968_v29 = vadd.f32 %v967_v22, %v886_v26 }
 0x10c   :  { %v969_v25 = vpop.f32.mrf.mxu1 }
 0x10d   :  { %v1063_v24 = vpop.f32.mrf.mxu0  ;;  %v970_v30 = vadd.f32 %v969_v25, %v888_v28 }
 0x10e   :  { %v1064_v32 = vadd.f32 %v1063_v24, %v968_v29 }
 0x10f   :  { %v1065_v31 = vpop.f32.mrf.mxu0 }
 0x110   :  { %v1066_v6 = vadd.f32 %v1065_v31, %v970_v30 }
 0x113   :  { %v1143_v5 = vpop.f32.mrf.mxu1 }
 0x114   :  { %v1144_v7 = vadd.f32 %v1143_v5, %v1064_v32 }
 0x115   :  { %v1145_v33 = vpop.f32.mrf.mxu1 }
 0x116   :  { %v1146_v34 = vadd.f32 %v1145_v33, %v1066_v6 }
 0x118   :  { %v1150_v11 = vcombine.low %v1144_v7, %v1146_v34 }
 0x11a   :  { %1153 = vst [vmem:[#allocation5 + $0x8] sm:$0xff] %v1150_v11 }
 0x11b   :  { %1211 = shalt.err (!%p1208_p9)
}
 0x11c   :  { %s1230_s23 = smov 128   ;;  %s1231_s24 = smov 8  }
 0x11d   :  { %1165 = dma.vmem_to_hbm [thread:$0]  %s1160_s21, 256, %s1536_s3, [#allocation4], %s1230_s23, %s1230_s23, %s1231_s24  }
 0x11e   :  { %1222 = dma.done.wait [#allocation4], 256  }
 0x11f   :  { %1223 = vsyncadd [#allocation4], 4294967040 }
 0x120   :  { %1169 = vsyncpa [#allocation3], 1 }
 0x121   :  { %1170 = vsyncpa [#allocation4], 1 }

</bundles_post_ra>
